<compile_context>
chip_gen: v5e
topology: v5e:2x2
jax: 0.10.0
libtpu: 0.0.40
codegen_flags: <defaults>
</compile_context>

<pallas_src>
import functools

import jax
import jax.numpy as jnp
from jax.experimental import pallas as pl
from jax.experimental.pallas import tpu as pltpu


def _group_norm_kernel(x_ref, w_ref, b_ref, o_ref, *, eps, hw, cg):
    """One row block. x_ref/o_ref: (r_blk, L = cg*hw); w_ref/b_ref: (r_blk, cg)."""
    # ---- Pass 1: per-row (= per (sample, group)) statistics, f32 accumulation.
    xf = x_ref[...].astype(jnp.float32)            # streamed; live range ends here
    n = xf.shape[-1]
    s = jnp.sum(xf, axis=-1, keepdims=True)        # (r_blk, 1)
    ss = jnp.sum(xf * xf, axis=-1, keepdims=True)  # (r_blk, 1)
    mean = s * (1.0 / n)
    # Unbiased (n-1) variance to match torch.Tensor.var() in the module.
    # Clamp at 0: single-pass ss - s^2/n can go slightly negative from f32
    # cancellation, which would make rsqrt produce NaN.
    inv_nm1 = (1.0 / (n - 1)) if n > 1 else float("inf")   # n==1 -> NaN, like torch
    var = jnp.maximum(ss - mean * s, 0.0) * inv_nm1
    inv_std = jax.lax.rsqrt(var + eps)

    # ---- Pass 2: normalize + per-channel affine, one FMA sweep per channel
    # segment of the lane axis.  Re-read x_ref per segment (native dtype) so no
    # full-block f32 copy is held live across the whole kernel.
    for c in range(cg):                            # static unroll; cg is small
        scale = inv_std * w_ref[:, c:c + 1].astype(jnp.float32)      # (r_blk, 1)
        shift = b_ref[:, c:c + 1].astype(jnp.float32) - mean * scale
        lo, hi = c * hw, (c + 1) * hw
        seg = x_ref[:, lo:hi].astype(jnp.float32)
        o_ref[:, lo:hi] = (seg * scale + shift).astype(o_ref.dtype)


def group_norm_ref(x, weight, bias, num_groups, eps=1e-5):
    """Pure-JAX reference mirroring the PyTorch forward (unbiased variance)."""
    N, C, H, W = x.shape
    G = num_groups
    xr = x.reshape(N, G, -1).astype(jnp.float32)
    mean = jnp.mean(xr, axis=-1, keepdims=True)
    var = jnp.sum((xr - mean) ** 2, axis=-1, keepdims=True) / (xr.shape[-1] - 1)
    xn = (xr - mean) / jnp.sqrt(var + eps)
    xn = xn.reshape(N, C, H, W)
    return (xn * weight + bias).astype(x.dtype)


def _legal_row_blocks(rows):
    """Row-block sizes Mosaic tiles cleanly as the second-minor block dim:
    multiples of 8 that divide `rows`, plus `rows` itself (full extent)."""
    legal = {rows}
    for d in range(8, rows + 1, 8):
        if rows % d == 0:
            legal.add(d)
    return sorted(legal)


def group_norm(x, weight, bias, num_groups, eps=1e-5,
               target_block_bytes=4 * 1024 * 1024,
               vmem_limit_bytes=48 * 1024 * 1024,
               min_grid_steps=4):
    """x: (N, C, H, W); weight, bias: (1, C, 1, 1). Matches the torch module."""
    N, C, H, W = x.shape
    G = num_groups
    assert C % G == 0, "num_groups must divide num_features"
    Cg = C // G
    HW = H * W
    L = Cg * HW
    R = N * G

    # TODO(synk): for very large Cg, switch the per-channel segment loop to a
    # fori_loop with pl.ds instead of falling back to XLA.
    if Cg > 128:
        return group_norm_ref(x, weight, bias, num_groups, eps)

    # Lane-dense 2-D views (pure reshapes of contiguous NCHW memory).
    xr = x.reshape(R, L)
    # Per-channel params tiled per (sample, group) row: only N*C floats.
    wg = weight.reshape(G, Cg)
    bg = bias.reshape(G, Cg)
    wr = jnp.broadcast_to(wg[None], (N, G, Cg)).reshape(R, Cg)
    br = jnp.broadcast_to(bg[None], (N, G, Cg)).reshape(R, Cg)

    # ---- Tile selection ------------------------------------------------------
    row_bytes_f32 = L * 4                      # f32 working size of one row
    legal = _legal_row_blocks(R)
    fits = [d for d in legal if d * row_bytes_f32 <= target_block_bytes]
    r_blk = fits[-1] if fits else legal[0]

    # Prefer >= min_grid_steps grid steps so the pipeline prologue/epilogue is
    # hidden and both v7x TensorCores get work (only while a smaller legal
    # block exists; tiny inputs simply collapse to fewer steps).
    while R // r_blk < min_grid_steps:
        smaller = [d for d in legal if d < r_blk]
        if not smaller:
            break
        r_blk = smaller[-1]

    # VMEM estimate: double-buffered input + output blocks + tiny param blocks.
    def vmem_bytes(rb):
        io = 2 * rb * L * x.dtype.itemsize * 2        # x and out, 2 buffers each
        params = 4 * rb * Cg * weight.dtype.itemsize  # w + b, 2 buffers each
        return io + params

    budget = int(vmem_limit_bytes * 0.8)
    while vmem_bytes(r_blk) > budget:
        smaller = [d for d in legal if d < r_blk]
        if not smaller:
            # TODO(synk): two-pass reduction kernel for single groups larger
            # than VMEM; use the XLA path instead of failing.
            return group_norm_ref(x, weight, bias, num_groups, eps)
        r_blk = smaller[-1]

    grid = (R // r_blk,)
    kernel = functools.partial(_group_norm_kernel, eps=eps, hw=HW, cg=Cg)

    out2 = pl.pallas_call(
        kernel,
        out_shape=jax.ShapeDtypeStruct((R, L), x.dtype),
        grid=grid,
        in_specs=[
            pl.BlockSpec((r_blk, L), lambda i: (i, 0)),
            pl.BlockSpec((r_blk, Cg), lambda i: (i, 0)),
            pl.BlockSpec((r_blk, Cg), lambda i: (i, 0)),
        ],
        out_specs=pl.BlockSpec((r_blk, L), lambda i: (i, 0)),
        compiler_params=pltpu.CompilerParams(
            dimension_semantics=("parallel",),
            vmem_limit_bytes=vmem_limit_bytes,
        ),
    )(xr, wr, br)

    return out2.reshape(N, C, H, W)


if __name__ == "__main__":
    # Small shapes consistent with the module's forward (NCHW conv feature map).
    N, C, H, W = 2, 4, 16, 16
    num_groups = 2      # must divide C; module default 32 assumes C >= 32
    eps = 1e-5

    kx, kw, kb = jax.random.split(jax.random.PRNGKey(0), 3)
    x = jax.random.normal(kx, (N, C, H, W), dtype=jnp.float32)
    # Deterministic, non-trivial affine params (module inits ones/zeros; use
    # perturbed values so the per-channel broadcast path is actually exercised).
    weight = 1.0 + 0.1 * jax.random.normal(kw, (1, C, 1, 1), dtype=jnp.float32)
    bias = 0.1 * jax.random.normal(kb, (1, C, 1, 1), dtype=jnp.float32)

    out = group_norm(x, weight, bias, num_groups, eps)
    out = jax.block_until_ready(out)

    ref = group_norm_ref(x, weight, bias, num_groups, eps)
    assert out.shape == (N, C, H, W)
    assert jnp.allclose(out, ref, atol=1e-4, rtol=1e-4), "mismatch vs reference"

    print("KERNEL_OK")
</pallas_src>

<mosaic_0001>
module attributes {stable_mosaic.version = 11 : i64} {
  func.func @_group_norm_kernel(%arg0: i32, %arg1: memref<4x512xf32, #tpu.memory_space<vmem>>, %arg2: memref<4x2xf32, #tpu.memory_space<vmem>>, %arg3: memref<4x2xf32, #tpu.memory_space<vmem>>, %arg4: memref<4x512xf32, #tpu.memory_space<vmem>>) attributes {dimension_semantics = [#tpu.dimension_semantics<parallel>], iteration_bounds = array<i64: 1>, scalar_prefetch = 0 : i64, scratch_operands = 0 : i64, tpu.core_type = #tpu.core_type<tc>, window_params = [{transform_indices = @transform_0, window_bounds = array<i64: 4, 512>}, {transform_indices = @transform_1, window_bounds = array<i64: 4, 2>}, {transform_indices = @transform_2, window_bounds = array<i64: 4, 2>}, {transform_indices = @transform_3, window_bounds = array<i64: 4, 512>}]} {
    %c0 = arith.constant 0 : index
    %c0_0 = arith.constant 0 : index
    %0 = vector.load %arg1[%c0, %c0_0] : memref<4x512xf32, #tpu.memory_space<vmem>>, vector<4x512xf32>
    %cst = arith.constant dense<0.000000e+00> : vector<4xf32>
    %1 = vector.multi_reduction <add>, %0, %cst [1] : vector<4x512xf32> to vector<4xf32>
    %2 = vector.shape_cast %1 : vector<4xf32> to vector<4x1xf32>
    %3 = arith.mulf %0, %0 : vector<4x512xf32>
    %cst_1 = arith.constant dense<0.000000e+00> : vector<4xf32>
    %4 = vector.multi_reduction <add>, %3, %cst_1 [1] : vector<4x512xf32> to vector<4xf32>
    %5 = vector.shape_cast %4 : vector<4xf32> to vector<4x1xf32>
    %cst_2 = arith.constant 0.001953125 : f32
    %6 = vector.broadcast %cst_2 : f32 to vector<4x1xf32>
    %7 = arith.mulf %2, %6 : vector<4x1xf32>
    %8 = arith.mulf %7, %2 : vector<4x1xf32>
    %9 = arith.subf %5, %8 : vector<4x1xf32>
    %cst_3 = arith.constant 0.000000e+00 : f32
    %10 = vector.broadcast %cst_3 : f32 to vector<4x1xf32>
    %11 = arith.maximumf %9, %10 : vector<4x1xf32>
    %cst_4 = arith.constant 0.00195694715 : f32
    %12 = vector.broadcast %cst_4 : f32 to vector<4x1xf32>
    %13 = arith.mulf %11, %12 : vector<4x1xf32>
    %cst_5 = arith.constant 9.99999974E-6 : f32
    %14 = vector.broadcast %cst_5 : f32 to vector<4x1xf32>
    %15 = arith.addf %13, %14 : vector<4x1xf32>
    %16 = math.rsqrt %15 : vector<4x1xf32>
    %c0_6 = arith.constant 0 : index
    %c0_7 = arith.constant 0 : index
    %17 = vector.load %arg2[%c0_6, %c0_7] : memref<4x2xf32, #tpu.memory_space<vmem>>, vector<4x1xf32>
    %18 = arith.mulf %16, %17 : vector<4x1xf32>
    %c0_8 = arith.constant 0 : index
    %c0_9 = arith.constant 0 : index
    %19 = vector.load %arg3[%c0_8, %c0_9] : memref<4x2xf32, #tpu.memory_space<vmem>>, vector<4x1xf32>
    %20 = arith.mulf %7, %18 : vector<4x1xf32>
    %21 = arith.subf %19, %20 : vector<4x1xf32>
    %c0_10 = arith.constant 0 : index
    %c0_11 = arith.constant 0 : index
    %22 = vector.load %arg1[%c0_10, %c0_11] : memref<4x512xf32, #tpu.memory_space<vmem>>, vector<4x256xf32>
    %23 = vector.broadcast %18 : vector<4x1xf32> to vector<4x256xf32>
    %24 = arith.mulf %22, %23 : vector<4x256xf32>
    %25 = vector.broadcast %21 : vector<4x1xf32> to vector<4x256xf32>
    %26 = arith.addf %24, %25 : vector<4x256xf32>
    %c0_12 = arith.constant 0 : index
    %c0_13 = arith.constant 0 : index
    %27 = vector.load %arg4[%c0_12, %c0_13] : memref<4x512xf32, #tpu.memory_space<vmem>>, vector<4x256xf32>
    tpu.vector_store %arg4[%c0_12, %c0_13], %26 {strides = array<i32>} : memref<4x512xf32, #tpu.memory_space<vmem>>, vector<4x256xf32>,
    %c0_14 = arith.constant 0 : index
    %c1 = arith.constant 1 : index
    %28 = vector.load %arg2[%c0_14, %c1] : memref<4x2xf32, #tpu.memory_space<vmem>>, vector<4x1xf32>
    %29 = arith.mulf %16, %28 : vector<4x1xf32>
    %c0_15 = arith.constant 0 : index
    %c1_16 = arith.constant 1 : index
    %30 = vector.load %arg3[%c0_15, %c1_16] : memref<4x2xf32, #tpu.memory_space<vmem>>, vector<4x1xf32>
    %31 = arith.mulf %7, %29 : vector<4x1xf32>
    %32 = arith.subf %30, %31 : vector<4x1xf32>
    %c0_17 = arith.constant 0 : index
    %c256 = arith.constant 256 : index
    %33 = vector.load %arg1[%c0_17, %c256] : memref<4x512xf32, #tpu.memory_space<vmem>>, vector<4x256xf32>
    %34 = vector.broadcast %29 : vector<4x1xf32> to vector<4x256xf32>
    %35 = arith.mulf %33, %34 : vector<4x256xf32>
    %36 = vector.broadcast %32 : vector<4x1xf32> to vector<4x256xf32>
    %37 = arith.addf %35, %36 : vector<4x256xf32>
    %c0_18 = arith.constant 0 : index
    %c256_19 = arith.constant 256 : index
    %38 = vector.load %arg4[%c0_18, %c256_19] : memref<4x512xf32, #tpu.memory_space<vmem>>, vector<4x256xf32>
    tpu.vector_store %arg4[%c0_18, %c256_19], %37 {strides = array<i32>} : memref<4x512xf32, #tpu.memory_space<vmem>>, vector<4x256xf32>,
    return
  }
  func.func @transform_0(%arg0: i32) -> (i32, i32) {
    %c0_i32 = arith.constant 0 : i32
    %c0_i32_0 = arith.constant 0 : i32
    return %arg0, %c0_i32 : i32, i32
  }
  func.func @transform_1(%arg0: i32) -> (i32, i32) {
    %c0_i32 = arith.constant 0 : i32
    %c0_i32_0 = arith.constant 0 : i32
    return %arg0, %c0_i32 : i32, i32
  }
  func.func @transform_2(%arg0: i32) -> (i32, i32) {
    %c0_i32 = arith.constant 0 : i32
    %c0_i32_0 = arith.constant 0 : i32
    return %arg0, %c0_i32 : i32, i32
  }
  func.func @transform_3(%arg0: i32) -> (i32, i32) {
    %c0_i32 = arith.constant 0 : i32
    %c0_i32_0 = arith.constant 0 : i32
    return %arg0, %c0_i32 : i32, i32
  }
}

</mosaic_0001>

<bundles_post_ra>
// kernel: tpu_custom_call.1
= control target key start
LH: loop header
LB: loop body
LE: loop exit
PB: predicated region body
PF: predicated region fallthrough
CT: control target
= control target key end

     0   :  { %8 = vsyncpa [#allocation3], 0  ;;  %s292_s0 = inlined_call_operand.hbm [shape: f32[4,512], index: 0, kind: input, shape index: {}]   ;;  %s293_s1 = inlined_call_operand.vmem [shape: f32[4,2], index: 1, kind: input, shape index: {}]   ;;  %s294_s2 = inlined_call_operand.vmem [shape: f32[4,2], index: 2, kind: input, shape index: {}]   ;;  %s295_s3 = inlined_call_operand.hbm [shape: f32[4,512], index: 3, kind: output, shape index: {}]  }
   0x1   :  { %9 = vsyncpa [#allocation4], 0  ;;  %s15_s14 = sshll.u32 %s292_s0, 4  ;;  %s229_s15 = smov [#allocation2]   ;;  %s16_s14 = int_to_ptr.hbm [resolvable:$true] %s15_s14 }
   0x2   :  { %s17_s16 = sshll.u32 %s229_s15, 4  ;;  %s18_s16 = int_to_ptr.vmem [resolvable:$true] %s17_s16 }
   0x3   :  { %20 = dma.hbm_to_vmem [thread:$0]  %s16_s14, 256, %s18_s16, [#allocation3]  }
   0x4   :  { %225 = dma.done.wait [#allocation3], 256  }
   0x5   :  { %226 = vsyncadd [#allocation3], 4294967040  ;;  %v257_v0 = vld [vmem:[#allocation2] sm:$0xff]  ;;  %v259_v1 = vld [vmem:[#allocation2 + $0x8] sm:$0xff]  ;;  %vm44_vm0 = vcmask 1043456   ;;  %v230_v26 = vmov 0  }
   0x6   :  { %33 = vst [vmem:[#allocation1] ss:$2 sm:$0xff] %v257_v0  ;;  %v54_v2 = vmul.f32 %v257_v0, %v257_v0  ;;  %v55_v3 = vmul.f32 %v259_v1, %v259_v1  ;;  %170 = vset.pattern.permute.xlu1 %v230_v26  ;;  %172 = vset.pattern.permute.xlu2 %v230_v26  ;;  %v231_v32 = vmov 1   ;;  %v94_v42 = vld [vmem:[%s293_s1] sm:$0xf]  ;;  %s155_s26 = sshll.u32 %s295_s3, 4  ;;  %s156_s26 = int_to_ptr.hbm [resolvable:$true] %s155_s26 }
   0x7   :  { %35 = vst [vmem:[#allocation1 + $0x10] ss:$2 sm:$0xff] %v259_v1  ;;  %174 = vset.pattern.permute.xlu0 %v231_v32  ;;  %v96_v45 = vld [vmem:[%s294_s2] sm:$0xf]  ;;  %v232_v53 = vmov 839922192  }
   0x8   :  { %v121_v46 = vld [vmem:[%s293_s1] sm:$0xf]  ;;  %v105_v54 = vunpack.c.l.s4 %v232_v53  ;;  %s233_s1 = smov [#allocation5]  }
   0x9   :  { %v123_v51 = vld [vmem:[%s294_s2] sm:$0xf]  ;;  %s153_s2 = sshll.u32 %s233_s1, 4  ;;  %s154_s2 = int_to_ptr.vmem [resolvable:$true] %s153_s2 }
   0xa   :  { %v106_v55 = vunpack.c.0.s8 %v105_v54 }
   0xd   :  { %v36_v4 = vld.sshfl [vmem:[#allocation1] sm:$0xff pattern:$0x75316420]  ;;  %v37_v5 = vld.sshfl [vmem:[#allocation1 + $0x8] sm:$0xff pattern:$0x75316420] }
   0xe   :  { %v38_v6 = vld.sshfl [vmem:[#allocation1 + $0x10] sm:$0xff pattern:$0x75316420]  ;;  %v39_v7 = vld.sshfl [vmem:[#allocation1 + $0x18] sm:$0xff pattern:$0x75316420] }
   0xf   :  { %v45_v8 = vsel %vm44_vm0, %v36_v4, 0.0  ;;  %v46_v9 = vsel %vm44_vm0, %v37_v5, 0.0  ;;  %v48_v10 = vsel %vm44_vm0, %v38_v6, 0.0  ;;  %58 = vst [vmem:[#allocation1] ss:$2 sm:$0xff] %v54_v2  ;;  %v50_v12 = vsel %vm44_vm0, %v39_v7, 0.0 }
  0x10   :  { %v47_v11 = vadd.f32 %v46_v9, %v45_v8  ;;  %60 = vst [vmem:[#allocation1 + $0x10] ss:$2 sm:$0xff] %v55_v3 }
  0x12   :  { %v49_v13 = vadd.f32 %v48_v10, %v47_v11 }
  0x14   :  { %v51_v14 = vadd.f32 %v50_v12, %v49_v13 }
  0x16   :  { %52 = vadd.xlane.f32.xlu0 %v51_v14  ;;  %v61_v15 = vld.sshfl [vmem:[#allocation1] sm:$0xff pattern:$0x75316420]  ;;  %v62_v16 = vld.sshfl [vmem:[#allocation1 + $0x8] sm:$0xff pattern:$0x75316420] }
  0x17   :  { %v63_v17 = vld.sshfl [vmem:[#allocation1 + $0x10] sm:$0xff pattern:$0x75316420]  ;;  %v64_v18 = vld.sshfl [vmem:[#allocation1 + $0x18] sm:$0xff pattern:$0x75316420] }
  0x18   :  { %v69_v19 = vsel %vm44_vm0, %v61_v15, 0.0  ;;  %v70_v20 = vsel %vm44_vm0, %v62_v16, 0.0  ;;  %v72_v21 = vsel %vm44_vm0, %v63_v17, 0.0  ;;  %v74_v23 = vsel %vm44_vm0, %v64_v18, 0.0 }
  0x19   :  { %v71_v22 = vadd.f32 %v70_v20, %v69_v19 }
  0x1b   :  { %v73_v24 = vadd.f32 %v72_v21, %v71_v22 }
  0x1d   :  { %v75_v25 = vadd.f32 %v74_v23, %v73_v24 }
  0x1f   :  { %76 = vadd.xlane.f32.xlu0 %v75_v25 }
  0x89   :  { %v53_v27 = vpop.xlane.xlu0 %52 }
  0x8a   :  { %v78_v28 = vmul.f32 0.001953125, %v53_v27 }
  0x8c   :  { %v79_v29 = vmul.f32 %v78_v28, %v53_v27 }
  0x92   :  { %v77_v30 = vpop.xlane.xlu0 %76 }
  0x93   :  { %v80_v31 = vsub.f32 %v77_v30, %v79_v29 }
  0x95   :  { %v81_v33 = vmax.f32 %v80_v31, 0.0 }
  0x97   :  { %v82_v34 = vmul.f32 0.0019569471, %v81_v33 }
  0x99   :  { %v83_v35 = vadd.f32 1e-05, %v82_v34 }
  0x9b   :  { %175 = vrsqrt.f32 %v83_v35  ;;  %vm90_vm2 = vweird.f32 %v83_v35 }
  0xa1   :  { %v176_v36 = vpop.eup %175 }
  0xa2   :  { %v85_v37 = vmul.f32 %v176_v36, %v83_v35  ;;  %vm91_vm1 = vweird.f32 %v176_v36 }
  0xa3   :  { %vm92_vm3 = vmor %vm90_vm2, %vm91_vm1 }
  0xa4   :  { %v86_v38 = vmul.f32 %v176_v36, %v85_v37 }
  0xa6   :  { %v87_v39 = vmul.f32 0.5, %v86_v38 }
  0xa8   :  { %v88_v40 = vsub.f32 1.5, %v87_v39 }
  0xaa   :  { %v89_v41 = vmul.f32 %v176_v36, %v88_v40 }
  0xac   :  { %v93_v43 = vsel %vm92_vm3, %v176_v36, %v89_v41 }
  0xad   :  { %v95_v44 = vmul.f32 %v94_v42, %v93_v43  ;;  %v122_v49 = vmul.f32 %v121_v46, %v93_v43 }
  0xaf   :  { %102 = vperm.xlu1 %170, %v95_v44   ;;  %v97_v47 = vmul.f32 %v95_v44, %v78_v28  ;;  %v124_v50 = vmul.f32 %v122_v49, %v78_v28 }
  0xb1   :  { %v98_v48 = vsub.f32 %v96_v45, %v97_v47  ;;  %v125_v52 = vsub.f32 %v123_v51, %v124_v50 }
  0xb3   :  { %112 = vperm.xlu2 %172, %v98_v48  }
  0xb7   :  { %171 = vset.pattern.permute.xlu1 %v231_v32 }
  0xb8   :  { %129 = vperm.xlu1 %171, %v122_v49  }
  0xbb   :  { %173 = vset.pattern.permute.xlu2 %v231_v32 }
  0xbc   :  { %139 = vperm.xlu2 %173, %v125_v52  }
 0x10d   :  { %v113_v56 = vpop.permute.xlu2 %112 }
 0x10e   :  { %v117_v59 = vperm.slane %v113_v56, %v106_v55 }
 0x116   :  { %v140_v62 = vpop.permute.xlu2 %139 }
 0x117   :  { %v144_v3 = vperm.slane %v140_v62, %v106_v55 }
 0x121   :  { %v103_v57 = vpop.permute.xlu1 %102 }
 0x122   :  { %v107_v58 = vperm.slane %v103_v57, %v106_v55 }
 0x124   :  { %v109_v60 = vmul.f32 %v107_v58, %v257_v0 }
 0x126   :  { %v119_v61 = vadd.f32 %v117_v59, %v109_v60 }
 0x128   :  { %120 = vst [vmem:[#allocation5] sm:$0xff] %v119_v61 }
 0x12a   :  { %v130_v63 = vpop.permute.xlu1 %129 }
 0x12b   :  { %v134_v2 = vperm.slane %v130_v63, %v106_v55 }
 0x12d   :  { %v136_v4 = vmul.f32 %v134_v2, %v259_v1 }
 0x12f   :  { %v146_v5 = vadd.f32 %v144_v3, %v136_v4 }
 0x131   :  { %147 = vst [vmem:[#allocation5 + $0x8] sm:$0xff] %v146_v5 }
 0x132   :  { %158 = dma.vmem_to_hbm [thread:$0]  %s154_s2, 256, %s156_s26, [#allocation4]  }
 0x133   :  { %227 = dma.done.wait [#allocation4], 256  }
 0x134   :  { %228 = vsyncadd [#allocation4], 4294967040 }
 0x135   :  { %163 = vsyncpa [#allocation3], 1 }
 0x136   :  { %164 = vsyncpa [#allocation4], 1 }

</bundles_post_ra>
